<compile_context>
chip_gen: v5e
topology: v5e:2x2
jax: 0.10.0
libtpu: 0.0.40
codegen_flags: <defaults>
</compile_context>

<pallas_src>
import functools
import math

import jax
import jax.numpy as jnp
import numpy as np
from jax.experimental import pallas as pl
from jax.experimental.pallas import tpu as pltpu


# ---------------------------------------------------------------------------
# Config (mirrors the `args` object of the PyTorch module)
# ---------------------------------------------------------------------------
class Args:
    n_heads = 4
    d_k = 8
    d_v = 8
    d_model = 32


LN_EPS = 1e-5        # nn.LayerNorm default
MASK_NEG = -1e9      # masked_fill value in the PyTorch source (semantic mask)
CROSS_NEG = -1e30    # extra-negative value for cross-batch entries of the folded scores


# ---------------------------------------------------------------------------
# Mask construction in pure JAX (used only by the reference check; mirrors
# get_attn_pad_mask / get_attn_subsequence_mask / attn_mask from the source)
# ---------------------------------------------------------------------------
def make_attn_mask(token_ids):
    """token_ids: [B, S] int ids (0 == pad).  Returns int32 [B, S, S], nonzero=masked."""
    b, s = token_ids.shape
    pad = (token_ids == 0)[:, None, :]
    pad = jnp.broadcast_to(pad, (b, s, s))
    subseq = jnp.triu(jnp.ones((s, s), dtype=jnp.int32), k=1)
    return ((pad.astype(jnp.int32) + subseq[None]) > 0).astype(jnp.int32)


# ---------------------------------------------------------------------------
# Kernel helpers
# ---------------------------------------------------------------------------
def _swap_last2(x):
    """Batched transpose of the last two dims built only from rank-2 transposes +
    a leading-axis stack (relayout ops already proven to lower on Mosaic)."""
    return jnp.stack([x[i].T for i in range(x.shape[0])], axis=0)


def _attention_tail(resid2, q_t, k_t, v_t, batch_row, batch_col, pad_col,
                    w_fc, gamma, beta, out_ref, attn_ref, *, H, dk, dv, M, D):
    """Shared attention tail.

    resid2    : [M, D]       residual (= flattened input_Q)
    q_t / k_t : [H*dk, M]    projected Q^T / K^T, rows ordered head-major (h, dk)
    v_t       : [H*dv, M]
    batch_row : [M, 1] int32 batch id of each flattened (b, s) position
    batch_col : [1, M] int32
    pad_col   : [1, M] int32 nonzero where the key token is <pad>
    """
    scale = jnp.float32(10.0 / math.sqrt(dk))

    # head split: leading-dim reshape only (no lane slicing)
    q3 = q_t.reshape(H, dk, M)
    k3 = k_t.reshape(H, dk, M)
    v3 = v_t.reshape(H, dv, M)

    # [H, M, dk] so the scores use the documented 'bqd,bkd->bqk' contraction form
    qh = _swap_last2(q3)
    kh = _swap_last2(k3)

    # ---- scores for all heads in one batched contraction: [H, M, M] ----------
    s = jnp.einsum('hmd,hnd->hmn', qh, kh,
                   preferred_element_type=jnp.float32) * scale

    # ---- mask built in-kernel from compact metadata (no [B,S,S] HBM bias) ----
    #   same-batch & (key-pad | causal)  -> exactly MASK_NEG  (masked_fill semantics)
    #   cross-batch (artifact of folding batch into the M axis) -> CROSS_NEG
    row = jax.lax.broadcasted_iota(jnp.int32, (M, M), 0)
    col = jax.lax.broadcasted_iota(jnp.int32, (M, M), 1)
    same_b = batch_row == batch_col                                  # [M, M]
    masked = jnp.logical_or(col > row, pad_col > 0)                  # [M, M]
    s = jnp.where(same_b,
                  jnp.where(masked, jnp.float32(MASK_NEG), s),
                  jnp.float32(CROSS_NEG))

    # ---- one softmax pass over all heads --------------------------------------
    m = jnp.max(s, axis=-1, keepdims=True)
    e = jnp.exp(s - m)
    denom = jnp.sum(e, axis=-1, keepdims=True)
    p = e * pl.reciprocal(denom, approx=False)                       # [H, M, M]

    attn_ref[...] = p        # single whole-ref store; wrapper extracts per-batch blocks

    # ---- context for all heads in one batched contraction ---------------------
    # ctx_t[h, d, m] = sum_n v3[h, d, n] * p[h, m, n]   (cross-batch p entries are 0)
    ctx_t = jnp.einsum('hdn,hmn->hdm', v3, p,
                       preferred_element_type=jnp.float32)           # [H, dv, M]
    ctx2 = ctx_t.reshape(H * dv, M).T                                # [M, H*dv], head-major

    # ---- output projection + residual + LayerNorm ------------------------------
    proj = jnp.dot(ctx2, w_fc, preferred_element_type=jnp.float32)   # [M, D]
    y = proj + resid2

    mean = jnp.mean(y, axis=-1, keepdims=True)
    var = jnp.mean((y - mean) ** 2, axis=-1, keepdims=True)
    y_norm = (y - mean) * jax.lax.rsqrt(var + LN_EPS)
    out_ref[...] = y_norm * gamma + beta                             # [M, D]


def _mha_self_kernel(x_ref, brow_ref, bcol_ref, pad_ref,
                     w_qkv_ref, w_fc_ref, gamma_ref, beta_ref,
                     out_ref, attn_ref,
                     *, n_heads, d_k, d_v, batch, seq_len, d_model):
    """Self-attention path: single input, fused QKV weight."""
    H, dk, dv = n_heads, d_k, d_v
    B, S, D = batch, seq_len, d_model
    M = B * S

    x2 = x_ref[...].reshape(M, D)                                     # [M, D]
    # one fused QKV MXU matmul for all of Q, K, V
    qkv = jnp.dot(x2, w_qkv_ref[...], preferred_element_type=jnp.float32)
    qkv_t = qkv.T                                                     # [2*H*dk + H*dv, M]
    q_t = qkv_t[:H * dk, :]                                           # row slices (tile-aligned)
    k_t = qkv_t[H * dk:2 * H * dk, :]
    v_t = qkv_t[2 * H * dk:, :]

    _attention_tail(x2, q_t, k_t, v_t,
                    brow_ref[...], bcol_ref[...], pad_ref[...],
                    w_fc_ref[...], gamma_ref[...], beta_ref[...],
                    out_ref, attn_ref, H=H, dk=dk, dv=dv, M=M, D=D)


def _mha_cross_kernel(xq_ref, xk_ref, xv_ref, brow_ref, bcol_ref, pad_ref,
                      wq_ref, wk_ref, wv_ref, w_fc_ref, gamma_ref, beta_ref,
                      out_ref, attn_ref,
                      *, n_heads, d_k, d_v, batch, seq_len, d_model):
    """General path (distinct Q/K/V inputs): three projections, same tail."""
    H, dk, dv = n_heads, d_k, d_v
    B, S, D = batch, seq_len, d_model
    M = B * S

    xq2 = xq_ref[...].reshape(M, D)
    xk2 = xk_ref[...].reshape(M, D)
    xv2 = xv_ref[...].reshape(M, D)
    q_t = jnp.dot(xq2, wq_ref[...], preferred_element_type=jnp.float32).T
    k_t = jnp.dot(xk2, wk_ref[...], preferred_element_type=jnp.float32).T
    v_t = jnp.dot(xv2, wv_ref[...], preferred_element_type=jnp.float32).T

    _attention_tail(xq2, q_t, k_t, v_t,
                    brow_ref[...], bcol_ref[...], pad_ref[...],
                    w_fc_ref[...], gamma_ref[...], beta_ref[...],
                    out_ref, attn_ref, H=H, dk=dk, dv=dv, M=M, D=D)


# ---------------------------------------------------------------------------
# Wrapper
# ---------------------------------------------------------------------------
def multi_head_attention(input_Q, input_K, input_V, token_ids,
                         W_Q, W_K, W_V, W_fc, gamma, beta, args):
    """
    input_Q/K/V : [B, S, d_model] float32
    token_ids   : [B, S] int32 token ids of the key sequence (0 == <pad>).  The
                  decoder self-attention mask (key padding | causal) is generated
                  inside the kernel from this compact per-position data.
    W_Q/W_K/W_V : [d_model, H*dk] / [d_model, H*dv]   ([in, out] layout)
    W_fc        : [H*dv, d_model]
    gamma/beta  : [d_model] LayerNorm affine parameters
    Returns (output [B,S,d_model], softmax_attn [B,H,S,S]).
    """
    # TODO(synk): an arbitrary externally precomputed [B,S,S] mask (e.g. a pure
    # encoder-decoder cross-attention mask) would need to be passed as a tensor
    # input instead of the compact pad+causal metadata used here.
    B, S, D = input_Q.shape
    H, dk, dv = args.n_heads, args.d_k, args.d_v
    M = B * S

    # compact O(B*S) mask metadata (the O(S^2) mask itself is built in-kernel)
    batch_id = jnp.repeat(jnp.arange(B, dtype=jnp.int32), S)          # [M]
    brow = batch_id.reshape(M, 1)
    bcol = batch_id.reshape(1, M)
    pad = (token_ids.reshape(1, M) == 0).astype(jnp.int32)            # [1, M]

    gamma2 = gamma.reshape(1, D).astype(jnp.float32)
    beta2 = beta.reshape(1, D).astype(jnp.float32)

    vmem = lambda: pl.BlockSpec(memory_space=pltpu.MemorySpace.VMEM)
    out_shapes = (
        jax.ShapeDtypeStruct((M, D), jnp.float32),      # LayerNorm output (flattened rows)
        jax.ShapeDtypeStruct((H, M, M), jnp.float32),   # per-head probs over flattened keys
    )

    self_attention = (input_Q is input_K) and (input_K is input_V)
    if self_attention:
        # fused QKV weight (in a real model, pre-fuse once at parameter-load time)
        w_qkv = jnp.concatenate([W_Q, W_K, W_V], axis=1)              # [D, 2*H*dk + H*dv]
        kernel = functools.partial(_mha_self_kernel, n_heads=H, d_k=dk, d_v=dv,
                                   batch=B, seq_len=S, d_model=D)
        out2, attn_full = pl.pallas_call(
            kernel,
            out_shape=out_shapes,
            in_specs=[vmem() for _ in range(8)],
            out_specs=(vmem(), vmem()),
        )(input_Q, brow, bcol, pad, w_qkv, W_fc, gamma2, beta2)
    else:
        kernel = functools.partial(_mha_cross_kernel, n_heads=H, d_k=dk, d_v=dv,
                                   batch=B, seq_len=S, d_model=D)
        out2, attn_full = pl.pallas_call(
            kernel,
            out_shape=out_shapes,
            in_specs=[vmem() for _ in range(12)],
            out_specs=(vmem(), vmem()),
        )(input_Q, input_K, input_V, brow, bcol, pad,
          W_Q, W_K, W_V, W_fc, gamma2, beta2)

    output = out2.reshape(B, S, D)
    # extract the per-batch diagonal blocks of the folded probability matrix (XLA, free)
    pf = attn_full.reshape(H, B, S, B, S)
    softmax_attn = jnp.stack([pf[:, b, :, b, :] for b in range(B)], axis=0)   # [B, H, S, S]
    return output, softmax_attn


# ---------------------------------------------------------------------------
# Pure-JAX reference (mirrors the PyTorch forward) for a sanity check
# ---------------------------------------------------------------------------
def reference(input_Q, input_K, input_V, mask_int, W_Q, W_K, W_V, W_fc,
              gamma, beta, args):
    B, S, D = input_Q.shape
    H, dk, dv = args.n_heads, args.d_k, args.d_v
    Q = (input_Q @ W_Q).reshape(B, S, H, dk).transpose(0, 2, 1, 3)
    K = (input_K @ W_K).reshape(B, S, H, dk).transpose(0, 2, 1, 3)
    V = (input_V @ W_V).reshape(B, S, H, dv).transpose(0, 2, 1, 3)
    attn = 10.0 * jnp.einsum('bhqd,bhkd->bhqk', Q, K) / np.sqrt(dk)
    attn = jnp.where(mask_int[:, None] > 0, MASK_NEG, attn)
    p = jax.nn.softmax(attn, axis=-1)
    qkv = jnp.einsum('bhqk,bhkd->bhqd', p, V)
    qkv = qkv.transpose(0, 2, 1, 3).reshape(B, S, H * dv)
    out = qkv @ W_fc + input_Q
    mean = out.mean(-1, keepdims=True)
    var = ((out - mean) ** 2).mean(-1, keepdims=True)
    out = (out - mean) / jnp.sqrt(var + LN_EPS) * gamma + beta
    return out, p


# ---------------------------------------------------------------------------
if __name__ == "__main__":
    args = Args()
    B, S, D = 2, 8, args.d_model
    H, dk, dv = args.n_heads, args.d_k, args.d_v

    key = jax.random.PRNGKey(0)
    k_x, k_q, k_k, k_v, k_fc = jax.random.split(key, 5)

    # nn.Linear weights (bias=False), pre-transposed to [in, out]
    W_Q = 0.02 * jax.random.normal(k_q, (D, H * dk), dtype=jnp.float32)
    W_K = 0.02 * jax.random.normal(k_k, (D, H * dk), dtype=jnp.float32)
    W_V = 0.02 * jax.random.normal(k_v, (D, H * dv), dtype=jnp.float32)
    W_fc = 0.02 * jax.random.normal(k_fc, (H * dv, D), dtype=jnp.float32)
    gamma = jnp.ones((D,), dtype=jnp.float32)    # LayerNorm weight
    beta = jnp.zeros((D,), dtype=jnp.float32)    # LayerNorm bias

    # token-embedding-like activations + token ids with trailing padding
    x = jax.random.normal(k_x, (B, S, D), dtype=jnp.float32)
    token_ids = jnp.array(
        [[5, 3, 9, 2, 7, 0, 0, 0],
         [1, 4, 6, 8, 2, 3, 9, 0]], dtype=jnp.int32)          # 0 == pad

    out, softmax_attn = multi_head_attention(
        x, x, x, token_ids, W_Q, W_K, W_V, W_fc, gamma, beta, args)
    jax.block_until_ready((out, softmax_attn))

    mask_int = make_attn_mask(token_ids)                       # [B, S, S] for the reference
    ref_out, ref_attn = reference(
        x, x, x, mask_int, W_Q, W_K, W_V, W_fc, gamma, beta, args)
    np.testing.assert_allclose(np.asarray(out), np.asarray(ref_out),
                               rtol=1e-4, atol=1e-4)
    np.testing.assert_allclose(np.asarray(softmax_attn), np.asarray(ref_attn),
                               rtol=1e-4, atol=1e-4)

    print("KERNEL_OK")
</pallas_src>

<mosaic_0001>
module attributes {stable_mosaic.version = 11 : i64} {
  func.func @_mha_self_kernel(%arg0: memref<2x8x32xf32, #tpu.memory_space<vmem>>, %arg1: memref<16x1xi32, #tpu.memory_space<vmem>>, %arg2: memref<1x16xi32, #tpu.memory_space<vmem>>, %arg3: memref<1x16xi32, #tpu.memory_space<vmem>>, %arg4: memref<32x96xf32, #tpu.memory_space<vmem>>, %arg5: memref<32x32xf32, #tpu.memory_space<vmem>>, %arg6: memref<1x32xf32, #tpu.memory_space<vmem>>, %arg7: memref<1x32xf32, #tpu.memory_space<vmem>>, %arg8: memref<16x32xf32, #tpu.memory_space<vmem>>, %arg9: memref<4x16x16xf32, #tpu.memory_space<vmem>>) attributes {dimension_semantics = [], scalar_prefetch = 0 : i64, scratch_operands = 0 : i64, tpu.core_type = #tpu.core_type<tc>} {
    %c0 = arith.constant 0 : index
    %c0_0 = arith.constant 0 : index
    %c0_1 = arith.constant 0 : index
    %0 = vector.load %arg0[%c0, %c0_0, %c0_1] : memref<2x8x32xf32, #tpu.memory_space<vmem>>, vector<2x8x32xf32>
    %1 = vector.shape_cast %0 : vector<2x8x32xf32> to vector<16x32xf32>
    %c0_2 = arith.constant 0 : index
    %c0_3 = arith.constant 0 : index
    %2 = vector.load %arg4[%c0_2, %c0_3] : memref<32x96xf32, #tpu.memory_space<vmem>>, vector<32x96xf32>
    %cst = arith.constant dense<0.000000e+00> : vector<16x96xf32>
    %3 = tpu.matmul %1, %2, %cst {dimension_numbers = #tpu.dot_dimension_numbers<[1], [0], [0], [1], [0, 0, 1, 1], [], []>} : vector<16x32xf32>, vector<32x96xf32>, vector<16x96xf32> -> vector<16x96xf32>
    %4 = tpu.transpose %3, [1, 0] : vector<16x96xf32> -> vector<96x16xf32>
    %5 = vector.extract_strided_slice %4 {offsets = [0, 0], sizes = [32, 16], strides = [1, 1]} : vector<96x16xf32> to vector<32x16xf32>
    %6 = vector.extract_strided_slice %4 {offsets = [32, 0], sizes = [32, 16], strides = [1, 1]} : vector<96x16xf32> to vector<32x16xf32>
    %7 = vector.extract_strided_slice %4 {offsets = [64, 0], sizes = [32, 16], strides = [1, 1]} : vector<96x16xf32> to vector<32x16xf32>
    %c0_4 = arith.constant 0 : index
    %c0_5 = arith.constant 0 : index
    %8 = vector.load %arg1[%c0_4, %c0_5] : memref<16x1xi32, #tpu.memory_space<vmem>>, vector<16x1xi32>
    %c0_6 = arith.constant 0 : index
    %c0_7 = arith.constant 0 : index
    %9 = vector.load %arg2[%c0_6, %c0_7] : memref<1x16xi32, #tpu.memory_space<vmem>>, vector<1x16xi32>
    %c0_8 = arith.constant 0 : index
    %c0_9 = arith.constant 0 : index
    %10 = vector.load %arg3[%c0_8, %c0_9] : memref<1x16xi32, #tpu.memory_space<vmem>>, vector<1x16xi32>
    %c0_10 = arith.constant 0 : index
    %c0_11 = arith.constant 0 : index
    %11 = vector.load %arg5[%c0_10, %c0_11] : memref<32x32xf32, #tpu.memory_space<vmem>>, vector<32x32xf32>
    %c0_12 = arith.constant 0 : index
    %c0_13 = arith.constant 0 : index
    %12 = vector.load %arg6[%c0_12, %c0_13] : memref<1x32xf32, #tpu.memory_space<vmem>>, vector<1x32xf32>
    %c0_14 = arith.constant 0 : index
    %c0_15 = arith.constant 0 : index
    %13 = vector.load %arg7[%c0_14, %c0_15] : memref<1x32xf32, #tpu.memory_space<vmem>>, vector<1x32xf32>
    %14 = vector.shape_cast %5 : vector<32x16xf32> to vector<4x8x16xf32>
    %15 = vector.shape_cast %6 : vector<32x16xf32> to vector<4x8x16xf32>
    %16 = vector.shape_cast %7 : vector<32x16xf32> to vector<4x8x16xf32>
    %17 = vector.extract_strided_slice %14 {offsets = [0, 0, 0], sizes = [1, 8, 16], strides = [1, 1, 1]} : vector<4x8x16xf32> to vector<1x8x16xf32>
    %18 = vector.shape_cast %17 : vector<1x8x16xf32> to vector<8x16xf32>
    %19 = tpu.transpose %18, [1, 0] : vector<8x16xf32> -> vector<16x8xf32>
    %20 = vector.extract_strided_slice %14 {offsets = [1, 0, 0], sizes = [1, 8, 16], strides = [1, 1, 1]} : vector<4x8x16xf32> to vector<1x8x16xf32>
    %21 = vector.shape_cast %20 : vector<1x8x16xf32> to vector<8x16xf32>
    %22 = tpu.transpose %21, [1, 0] : vector<8x16xf32> -> vector<16x8xf32>
    %23 = vector.extract_strided_slice %14 {offsets = [2, 0, 0], sizes = [1, 8, 16], strides = [1, 1, 1]} : vector<4x8x16xf32> to vector<1x8x16xf32>
    %24 = vector.shape_cast %23 : vector<1x8x16xf32> to vector<8x16xf32>
    %25 = tpu.transpose %24, [1, 0] : vector<8x16xf32> -> vector<16x8xf32>
    %26 = vector.extract_strided_slice %14 {offsets = [3, 0, 0], sizes = [1, 8, 16], strides = [1, 1, 1]} : vector<4x8x16xf32> to vector<1x8x16xf32>
    %27 = vector.shape_cast %26 : vector<1x8x16xf32> to vector<8x16xf32>
    %28 = tpu.transpose %27, [1, 0] : vector<8x16xf32> -> vector<16x8xf32>
    %29 = vector.shape_cast %19 : vector<16x8xf32> to vector<1x16x8xf32>
    %30 = vector.shape_cast %22 : vector<16x8xf32> to vector<1x16x8xf32>
    %31 = vector.shape_cast %25 : vector<16x8xf32> to vector<1x16x8xf32>
    %32 = vector.shape_cast %28 : vector<16x8xf32> to vector<1x16x8xf32>
    %33 = tpu.concatenate %29, %30, %31, %32 in 0 : vector<1x16x8xf32>, vector<1x16x8xf32>, vector<1x16x8xf32>, vector<1x16x8xf32> -> vector<4x16x8xf32>
    %34 = vector.extract_strided_slice %15 {offsets = [0, 0, 0], sizes = [1, 8, 16], strides = [1, 1, 1]} : vector<4x8x16xf32> to vector<1x8x16xf32>
    %35 = vector.shape_cast %34 : vector<1x8x16xf32> to vector<8x16xf32>
    %36 = tpu.transpose %35, [1, 0] : vector<8x16xf32> -> vector<16x8xf32>
    %37 = vector.extract_strided_slice %15 {offsets = [1, 0, 0], sizes = [1, 8, 16], strides = [1, 1, 1]} : vector<4x8x16xf32> to vector<1x8x16xf32>
    %38 = vector.shape_cast %37 : vector<1x8x16xf32> to vector<8x16xf32>
    %39 = tpu.transpose %38, [1, 0] : vector<8x16xf32> -> vector<16x8xf32>
    %40 = vector.extract_strided_slice %15 {offsets = [2, 0, 0], sizes = [1, 8, 16], strides = [1, 1, 1]} : vector<4x8x16xf32> to vector<1x8x16xf32>
    %41 = vector.shape_cast %40 : vector<1x8x16xf32> to vector<8x16xf32>
    %42 = tpu.transpose %41, [1, 0] : vector<8x16xf32> -> vector<16x8xf32>
    %43 = vector.extract_strided_slice %15 {offsets = [3, 0, 0], sizes = [1, 8, 16], strides = [1, 1, 1]} : vector<4x8x16xf32> to vector<1x8x16xf32>
    %44 = vector.shape_cast %43 : vector<1x8x16xf32> to vector<8x16xf32>
    %45 = tpu.transpose %44, [1, 0] : vector<8x16xf32> -> vector<16x8xf32>
    %46 = vector.shape_cast %36 : vector<16x8xf32> to vector<1x16x8xf32>
    %47 = vector.shape_cast %39 : vector<16x8xf32> to vector<1x16x8xf32>
    %48 = vector.shape_cast %42 : vector<16x8xf32> to vector<1x16x8xf32>
    %49 = vector.shape_cast %45 : vector<16x8xf32> to vector<1x16x8xf32>
    %50 = tpu.concatenate %46, %47, %48, %49 in 0 : vector<1x16x8xf32>, vector<1x16x8xf32>, vector<1x16x8xf32>, vector<1x16x8xf32> -> vector<4x16x8xf32>
    "tpu.trace_start"() <{level = 10 : i32, message = "hmd,hnd->hmn"}> : () -> ()
    %cst_16 = arith.constant dense<0.000000e+00> : vector<4x16x16xf32>
    %51 = tpu.matmul %33, %50, %cst_16 {dimension_numbers = #tpu.dot_dimension_numbers<[2], [2], [1], [1], [0, 0, 0, 1, 1, 1], [0], [0]>} : vector<4x16x8xf32>, vector<4x16x8xf32>, vector<4x16x16xf32> -> vector<4x16x16xf32>
    "tpu.trace_stop"() : () -> ()
    %cst_17 = arith.constant 3.53553391 : f32
    %52 = vector.broadcast %cst_17 : f32 to vector<4x16x16xf32>
    %53 = arith.mulf %51, %52 : vector<4x16x16xf32>
    %54 = tpu.iota {dimensions = array<i32: 0>} : vector<16x16xi32>
    %55 = tpu.iota {dimensions = array<i32: 1>} : vector<16x16xi32>
    %56 = vector.broadcast %8 : vector<16x1xi32> to vector<16x16xi32>
    %57 = vector.broadcast %9 : vector<1x16xi32> to vector<16x16xi32>
    %58 = arith.cmpi eq, %56, %57 : vector<16x16xi32>
    %59 = arith.cmpi sgt, %55, %54 : vector<16x16xi32>
    %c0_i32 = arith.constant 0 : i32
    %60 = vector.broadcast %c0_i32 : i32 to vector<1x16xi32>
    %61 = arith.cmpi sgt, %10, %60 : vector<1x16xi32>
    %62 = vector.broadcast %61 : vector<1x16xi1> to vector<16x16xi1>
    %63 = arith.ori %59, %62 : vector<16x16xi1>
    %cst_18 = arith.constant -1.000000e+09 : f32
    %64 = vector.shape_cast %63 : vector<16x16xi1> to vector<1x16x16xi1>
    %65 = vector.broadcast %64 : vector<1x16x16xi1> to vector<4x16x16xi1>
    %66 = vector.broadcast %cst_18 : f32 to vector<4x16x16xf32>
    %67 = arith.select %65, %66, %53 : vector<4x16x16xi1>, vector<4x16x16xf32>
    %cst_19 = arith.constant -1.000000e+30 : f32
    %68 = vector.shape_cast %58 : vector<16x16xi1> to vector<1x16x16xi1>
    %69 = vector.broadcast %68 : vector<1x16x16xi1> to vector<4x16x16xi1>
    %70 = vector.broadcast %cst_19 : f32 to vector<4x16x16xf32>
    %71 = arith.select %69, %67, %70 : vector<4x16x16xi1>, vector<4x16x16xf32>
    %cst_20 = arith.constant dense<0xFF800000> : vector<4x16xf32>
    %72 = vector.multi_reduction <maximumf>, %71, %cst_20 [2] : vector<4x16x16xf32> to vector<4x16xf32>
    %73 = vector.shape_cast %72 : vector<4x16xf32> to vector<4x16x1xf32>
    %74 = vector.broadcast %73 : vector<4x16x1xf32> to vector<4x16x16xf32>
    %75 = arith.subf %71, %74 : vector<4x16x16xf32>
    %76 = math.exp %75 : vector<4x16x16xf32>
    %cst_21 = arith.constant dense<0.000000e+00> : vector<4x16xf32>
    %77 = vector.multi_reduction <add>, %76, %cst_21 [2] : vector<4x16x16xf32> to vector<4x16xf32>
    %78 = vector.shape_cast %77 : vector<4x16xf32> to vector<4x16x1xf32>
    %79 = tpu.reciprocal %78 : vector<4x16x1xf32> -> vector<4x16x1xf32>
    %80 = vector.broadcast %79 : vector<4x16x1xf32> to vector<4x16x16xf32>
    %81 = arith.mulf %76, %80 : vector<4x16x16xf32>
    %c0_22 = arith.constant 0 : index
    %c0_23 = arith.constant 0 : index
    %c0_24 = arith.constant 0 : index
    %82 = vector.load %arg9[%c0_22, %c0_23, %c0_24] : memref<4x16x16xf32, #tpu.memory_space<vmem>>, vector<4x16x16xf32>
    tpu.vector_store %arg9[%c0_22, %c0_23, %c0_24], %81 {strides = array<i32>} : memref<4x16x16xf32, #tpu.memory_space<vmem>>, vector<4x16x16xf32>,
    "tpu.trace_start"() <{level = 10 : i32, message = "hdn,hmn->hdm"}> : () -> ()
    %cst_25 = arith.constant dense<0.000000e+00> : vector<4x8x16xf32>
    %83 = tpu.matmul %16, %81, %cst_25 {dimension_numbers = #tpu.dot_dimension_numbers<[2], [2], [1], [1], [0, 0, 0, 1, 1, 1], [0], [0]>} : vector<4x8x16xf32>, vector<4x16x16xf32>, vector<4x8x16xf32> -> vector<4x8x16xf32>
    "tpu.trace_stop"() : () -> ()
    %84 = vector.shape_cast %83 : vector<4x8x16xf32> to vector<32x16xf32>
    %85 = tpu.transpose %84, [1, 0] : vector<32x16xf32> -> vector<16x32xf32>
    %cst_26 = arith.constant dense<0.000000e+00> : vector<16x32xf32>
    %86 = tpu.matmul %85, %11, %cst_26 {dimension_numbers = #tpu.dot_dimension_numbers<[1], [0], [0], [1], [0, 0, 1, 1], [], []>} : vector<16x32xf32>, vector<32x32xf32>, vector<16x32xf32> -> vector<16x32xf32>
    %87 = arith.addf %86, %1 : vector<16x32xf32>
    %cst_27 = arith.constant dense<0.000000e+00> : vector<16xf32>
    %88 = vector.multi_reduction <add>, %87, %cst_27 [1] : vector<16x32xf32> to vector<16xf32>
    %89 = vector.shape_cast %88 : vector<16xf32> to vector<16x1xf32>
    %cst_28 = arith.constant 3.200000e+01 : f32
    %90 = vector.broadcast %cst_28 : f32 to vector<16x1xf32>
    %91 = arith.divf %89, %90 : vector<16x1xf32>
    %92 = vector.broadcast %91 : vector<16x1xf32> to vector<16x32xf32>
    %93 = arith.subf %87, %92 : vector<16x32xf32>
    %94 = arith.mulf %93, %93 : vector<16x32xf32>
    %cst_29 = arith.constant dense<0.000000e+00> : vector<16xf32>
    %95 = vector.multi_reduction <add>, %94, %cst_29 [1] : vector<16x32xf32> to vector<16xf32>
    %96 = vector.shape_cast %95 : vector<16xf32> to vector<16x1xf32>
    %cst_30 = arith.constant 3.200000e+01 : f32
    %97 = vector.broadcast %cst_30 : f32 to vector<16x1xf32>
    %98 = arith.divf %96, %97 : vector<16x1xf32>
    %99 = vector.broadcast %91 : vector<16x1xf32> to vector<16x32xf32>
    %100 = arith.subf %87, %99 : vector<16x32xf32>
    %cst_31 = arith.constant 9.99999974E-6 : f32
    %101 = vector.broadcast %cst_31 : f32 to vector<16x1xf32>
    %102 = arith.addf %98, %101 : vector<16x1xf32>
    %103 = math.rsqrt %102 : vector<16x1xf32>
    %104 = vector.broadcast %103 : vector<16x1xf32> to vector<16x32xf32>
    %105 = arith.mulf %100, %104 : vector<16x32xf32>
    %106 = vector.broadcast %12 : vector<1x32xf32> to vector<16x32xf32>
    %107 = arith.mulf %105, %106 : vector<16x32xf32>
    %108 = vector.broadcast %13 : vector<1x32xf32> to vector<16x32xf32>
    %109 = arith.addf %107, %108 : vector<16x32xf32>
    %c0_32 = arith.constant 0 : index
    %c0_33 = arith.constant 0 : index
    %110 = vector.load %arg8[%c0_32, %c0_33] : memref<16x32xf32, #tpu.memory_space<vmem>>, vector<16x32xf32>
    tpu.vector_store %arg8[%c0_32, %c0_33], %109 {strides = array<i32>} : memref<16x32xf32, #tpu.memory_space<vmem>>, vector<16x32xf32>,
    return
  }
}

</mosaic_0001>

<bundles_post_ra>
// kernel: tpu_custom_call.1
= control target key start
LH: loop header
LB: loop body
LE: loop exit
PB: predicated region body
PF: predicated region fallthrough
CT: control target
= control target key end

     0   :  { %15 = vsyncpa [#allocation3], 0  ;;  %s1526_s0 = inlined_call_operand.vmem [shape: f32[2,8,32], index: 0, kind: input, shape index: {}]   ;;  %s1527_s1 = inlined_call_operand.vmem [shape: s32[16,1], index: 1, kind: input, shape index: {}]   ;;  %s1528_s2 = inlined_call_operand.vmem [shape: s32[1,16], index: 2, kind: input, shape index: {}]   ;;  %s1529_s3 = inlined_call_operand.vmem [shape: s32[1,16], index: 3, kind: input, shape index: {}]   ;;  %s1530_s4 = inlined_call_operand.hbm [shape: f32[32,96], index: 4, kind: input, shape index: {}]   ;;  %s1531_s5 = inlined_call_operand.hbm [shape: f32[32,32], index: 5, kind: input, shape index: {}]   ;;  %s1532_s6 = inlined_call_operand.vmem [shape: f32[1,32], index: 6, kind: input, shape index: {}]   ;;  %s1533_s7 = inlined_call_operand.vmem [shape: f32[1,32], index: 7, kind: input, shape index: {}]   ;;  %s1534_s8 = inlined_call_operand.hbm [shape: f32[16,32], index: 8, kind: output, shape index: {0}]   ;;  %s1535_s9 = inlined_call_operand.hbm [shape: f32[4,16,16], index: 9, kind: output, shape index: {1}]  }
   0x1   :  { %16 = vsyncpa [#allocation6], 0 }
   0x2   :  { %17 = vsyncpa [#allocation4], 0 }
   0x3   :  { %18 = vsyncpa [#allocation9], 0  ;;  %s31_s11 = sshll.u32 %s1530_s4, 4  ;;  %s1264_s12 = smov [#allocation2]   ;;  %s32_s11 = int_to_ptr.hbm [resolvable:$true] %s31_s11 }
   0x4   :  { %s33_s13 = sshll.u32 %s1264_s12, 4  ;;  %s44_s16 = sshll.u32 %s1531_s5, 4  ;;  %s34_s13 = int_to_ptr.vmem [resolvable:$true] %s33_s13  ;;  %s45_s16 = int_to_ptr.hbm [resolvable:$true] %s44_s16 }
   0x5   :  { %s1265_s17 = smov 128   ;;  %s1266_s18 = smov 8  }
   0x6   :  { %39 = dma.hbm_to_vmem [thread:$0]  %s32_s11, 512, %s34_s13, [#allocation3], %s1265_s17, %s1265_s17, %s1266_s18  }
   0x7   :  { %s1267_s19 = smov [#allocation5]  }
   0x8   :  { %s46_s20 = sshll.u32 %s1267_s19, 4  ;;  %s47_s20 = int_to_ptr.vmem [resolvable:$true] %s46_s20 }
   0x9   :  { %52 = dma.hbm_to_vmem [thread:$0]  %s45_s16, 512, %s47_s20, [#allocation6], %s1265_s17, %s1265_s17, %s1266_s18  }
   0xa   :  { %1256 = dma.done.wait [#allocation3], 512  }
   0xb   :  { %1257 = vsyncadd [#allocation3], 4294966784 }
   0xc   :  { %1258 = dma.done.wait [#allocation6], 512  }
   0xd   :  { %1259 = vsyncadd [#allocation6], 4294966784  ;;  %v70_v0 = vld [vmem:[#allocation2 + $0x18] sm:$0xff]  ;;  %v69_v1 = vld [vmem:[#allocation2 + $0x10] sm:$0xff]  ;;  %vm71_vm0 = vcmask 261120   ;;  %vm399_vm1 = vcmask 64512   ;;  %v548_v40 = vlaneseq }
   0xe   :  { %90 = vmatpush.msra.mxu0 %v70_v0  ;;  %v68_v2 = vld [vmem:[#allocation2 + $0x8] sm:$0xff]  ;;  %v67_v3 = vld [vmem:[#allocation2] sm:$0xff]  ;;  %v1268_v23 = vmov 0   ;;  %vm594_vm8 = vcmask 130048   ;;  %s1054_s10 = sshll.u32 %s1535_s9, 4  ;;  %s1041_s19 = sshll.u32 %s1534_s8, 4  ;;  %s1055_s10 = int_to_ptr.hbm [resolvable:$true] %s1054_s10  ;;  %s1042_s19 = int_to_ptr.hbm [resolvable:$true] %s1041_s19 }
   0xf   :  { %v1337_v4 = vld [vmem:[%s1526_s0] sm:$0xff]  ;;  %v1344_v5 = vld [vmem:[%s1526_s0 + $0x8] sm:$0xff]  ;;  %v549_v41 = vshrl.u32 %v548_v40, 7  ;;  %v552_v45 = vand.u32 127, %v548_v40 }
  0x10   :  { %91 = vmatpush.msra.mxu0 %v69_v1  ;;  %v133_v22 = vld [vmem:[%s1527_s1] sm:$0xff]  ;;  %v134_v32 = vld [vmem:[%s1527_s1 + $0x8] sm:$0xff] }
  0x11   :  { %v136_v39 = vld [vmem:[%s1529_s3] sm:$0x1]  ;;  %v550_v44 = vadd.s32 8, %v549_v41  ;;  %vm562_vm7 = vcmp.gt.s32.totalorder %v552_v45, %v549_v41 }
  0x12   :  { %92 = vmatpush.msra.mxu0 %v68_v2  ;;  %vm564_vm2 = vcmp.gt.s32.totalorder %v136_v39, 0  ;;  %v1119_v47 = vld [vmem:[%s1528_s2] ss:$0 sm:$0xff]  ;;  %s1270_s2 = smov [#allocation8]  }
  0x13   :  { %v565_v42 = vsel %vm564_vm2, 1, %v1268_v23  ;;  %vm563_vm3 = vcmp.gt.s32.totalorder %v552_v45, %v550_v44  ;;  %s1052_s3 = sshll.u32 %s1270_s2, 4  ;;  %s1053_s3 = int_to_ptr.vmem [resolvable:$true] %s1052_s3 }
  0x14   :  { %93 = vmatpush.msra.mxu0 %v67_v3  ;;  %v566_v46 = vperm.slane %v565_v42, 0 }
  0x15   :  { %1073 = vmatmul.msk.f32.vlgmr.msra.gmra.mxu0 %vm71_vm0, %v1337_v4 }
  0x16   :  { %vm567_vm4 = vcmp.eq.s32.totalorder %v566_v46, 1 }
  0x17   :  { %vm1386_vm5 = vmor %vm563_vm3, %vm567_vm4 }
  0x18   :  { %vm1393_vm9 = vmor %vm562_vm7, %vm567_vm4 }
  0x1d   :  { %1074 = vmatmul.msk.f32.gmra.mxu0 %vm71_vm0, %v1344_v5 }
  0x92   :  { %v95_v6 = vpop.f32.mrf.mxu0 }
  0x93   :  { %101 = vxpose.xlu0.b32.start [1/2] (short) (narrow) %v95_v6, 96 }
  0x9a   :  { %v98_v7 = vpop.f32.mrf.mxu0 }
  0x9b   :  { %102 = vxpose.xlu0.b32.end [2/2] (short) (narrow) %v98_v7, 96 }
 0x137   :  { %v117_v8 = vpop.trf.xlu0 }
 0x13f   :  { %v118_v9 = vpop.trf.xlu0 }
 0x147   :  { %v119_v10 = vpop.trf.xlu0 }
 0x148   :  { %207 = vxpose.xlu0.b32.start.end [1/1] (short) (narrow) %v119_v10, 16 }
 0x14f   :  { %v120_v11 = vpop.trf.xlu0 }
 0x157   :  { %v121_v12 = vpop.trf.xlu0 }
 0x158   :  { %271 = vxpose.xlu2.b32.start.end [1/1] (short) (narrow) %v121_v12, 16 }
 0x15f   :  { %v122_v13 = vpop.trf.xlu0 }
 0x160   :  { %303 = vxpose.xlu1.b32.start.end [1/1] (short) (narrow) %v122_v13, 16 }
 0x167   :  { %v123_v14 = vpop.trf.xlu0 }
 0x168   :  { %335 = vxpose.xlu2.b32.start.end [1/1] (short) (narrow) %v123_v14, 16 }
 0x16f   :  { %v124_v15 = vpop.trf.xlu0 }
 0x170   :  { %175 = vxpose.xlu1.b32.start.end [1/1] (short) (narrow) %v118_v9, 16 }
 0x177   :  { %v1348_v17 = vpop.trf.xlu0 }
 0x178   :  { %143 = vxpose.xlu2.b32.start.end [1/1] (short) (narrow) %v117_v8, 16 }
 0x17f   :  { %v1352_v20 = vpop.trf.xlu0 }
 0x180   :  { %367 = vxpose.xlu1.b32.start.end [1/1] (short) (narrow) %v124_v15, 16 }
 0x187   :  { %v1357_v26 = vpop.trf.xlu0 }
 0x18f   :  { %v1367_v29 = vpop.trf.xlu0 }
 0x190   :  { %239 = vxpose.xlu1.b32.start.end [1/1] (short) (narrow) %v120_v11, 16 }
 0x1af   :  { %1118 = vset.pattern.permute.xlu0 %v1268_v23 }
 0x1da   :  { %1116 = vset.pattern.permute.xlu2 %v1268_v23 }
 0x1e3   :  { %1117 = vset.pattern.permute.xlu1 %v1268_v23 }
 0x1e9   :  { %557 = vperm.xlu2 %1116, %v134_v32  }
 0x1ec   :  { %v223_v33 = vpop.trf.xlu0 }
 0x1f1   :  { %v287_v16 = vpop.trf.xlu2 }
 0x1f2   :  { %554 = vperm.xlu1 %1117, %v133_v22  }
 0x1f4   :  { %v224_v35 = vpop.trf.xlu0 }
 0x1f9   :  { %v288_v18 = vpop.trf.xlu2 }
 0x1fa   :  { %1075 = vmatpush.xpose.msk.msra.mxu1 %vm399_vm1, %v288_v18 }
 0x1fe   :  { %1076 = vmatpush.xpose.msk.msra.mxu1 %vm399_vm1, %v287_v16 }
 0x201   :  { %v351_v19 = vpop.trf.xlu2 }
 0x204   :  { %v319_v21 = vpop.trf.xlu1 }
 0x209   :  { %v352_v24 = vpop.trf.xlu2 }
 0x20c   :  { %v320_v25 = vpop.trf.xlu1 }
 0x20d   :  { %1079 = vmatpush.xpose.msk.msra.mxu2 %vm399_vm1, %v320_v25  ;;  %1105 = vmatpush.xpose.msk.msra.mxu3 %vm399_vm1, %v320_v25 }
 0x211   :  { %1080 = vmatpush.xpose.msk.msra.mxu2 %vm399_vm1, %v319_v21  ;;  %1106 = vmatpush.xpose.msk.msra.mxu3 %vm399_vm1, %v319_v21  ;;  %v159_v27 = vpop.trf.xlu2 }
 0x212   :  { %1077 = vmatmul.msk.f32.vlgmr.msra.gmra.mxu1 %vm399_vm1, %v159_v27 }
 0x214   :  { %v191_v28 = vpop.trf.xlu1 }
 0x215   :  { %1083 = vmatpush.xpose.msk.msrb.mxu3 %vm399_vm1, %v352_v24  ;;  %1081 = vmatmul.msk.f32.vlgmr.msra.gmra.mxu2 %vm399_vm1, %v191_v28 }
 0x219   :  { %1084 = vmatpush.xpose.msk.msrb.mxu3 %vm399_vm1, %v351_v19  ;;  %v160_v30 = vpop.trf.xlu2 }
 0x21a   :  { %1078 = vmatmul.msk.f32.gmra.mxu1 %vm399_vm1, %v160_v30 }
 0x21c   :  { %v192_v31 = vpop.trf.xlu1 }
 0x21d   :  { %1082 = vmatmul.msk.f32.vlgmr.msra.gmra.mxu3 %vm399_vm1, %v192_v31 }
 0x224   :  { %v383_v34 = vpop.trf.xlu1 }
 0x225   :  { %1085 = vmatmul.msk.f32.vlgmr.msrb.gmra.mxu3 %vm399_vm1, %v223_v33 }
 0x22c   :  { %v384_v36 = vpop.trf.xlu1 }
 0x22d   :  { %1086 = vmatmul.msk.f32.gmra.mxu3 %vm399_vm1, %v224_v35  ;;  %1087 = vmatpush.xpose.msk.msrb.mxu0 %vm399_vm1, %v384_v36 }
 0x231   :  { %1088 = vmatpush.xpose.msk.msrb.mxu0 %vm399_vm1, %v383_v34 }
 0x234   :  { %v255_v37 = vpop.trf.xlu1 }
 0x235   :  { %1089 = vmatmul.msk.f32.vlgmr.msrb.gmra.mxu0 %vm399_vm1, %v255_v37 }
 0x23c   :  { %v256_v38 = vpop.trf.xlu1 }
 0x23d   :  { %1090 = vmatmul.msk.f32.gmra.mxu0 %vm399_vm1, %v256_v38 }
 0x243   :  { %v558_v48 = vpop.permute.xlu2 %557 }
 0x244   :  { %vm561_vm6 = vcmp.eq.s32.totalorder %v558_v48, %v1119_v47 }
 0x264   :  { %v555_v55 = vpop.permute.xlu1 %554 }
 0x265   :  { %vm560_vm10 = vcmp.eq.s32.totalorder %v555_v55, %v1119_v47 }
 0x28f   :  { %v429_v43 = vpop.f32.mrf.mxu1 }
 0x290   :  { %v540_v13 = vmul.f32 3.535534, %v429_v43 }
 0x292   :  { %v574_v23 = vsel %vm1393_vm9, -1e+09, %v540_v13 }
 0x293   :  { %v586_v25 = vsel %vm560_vm10, %v574_v23, -1e+30 }
 0x294   :  { %v595_v28 = vsel %vm594_vm8, %v586_v25, -inf }
 0x297   :  { %v432_v49 = vpop.f32.mrf.mxu1 }
 0x298   :  { %v541_v51 = vmul.f32 3.535534, %v432_v49  ;;  %v464_v52 = vpop.f32.mrf.mxu2 }
 0x299   :  { %v542_v53 = vmul.f32 3.535534, %v464_v52 }
 0x29a   :  { %v575_v54 = vsel %vm1386_vm5, -1e+09, %v541_v51 }
 0x29b   :  { %v587_v56 = vsel %vm561_vm6, %v575_v54, -1e+30  ;;  %v576_v59 = vsel %vm1393_vm9, -1e+09, %v542_v53 }
 0x29c   :  { %v598_v58 = vsel %vm594_vm8, %v587_v56, -inf  ;;  %v588_v62 = vsel %vm560_vm10, %v576_v59, -1e+30 }
 0x29d   :  { %599 = vmax.xlane.f32.xlu2 %v598_v58  ;;  %v601_v0 = vsel %vm594_vm8, %v588_v62, -inf }
 0x2a0   :  { %v467_v60 = vpop.f32.mrf.mxu3 }
 0x2a1   :  { %v543_v61 = vmul.f32 3.535534, %v467_v60 }
 0x2a3   :  { %v577_v63 = vsel %vm1386_vm5, -1e+09, %v543_v61 }
 0x2a4   :  { %v589_v1 = vsel %vm561_vm6, %v577_v63, -1e+30 }
 0x2a5   :  { %602 = vmax.xlane.f32.xlu2 %v601_v0  ;;  %v604_v2 = vsel %vm594_vm8, %v589_v1, -inf }
 0x2a6   :  { %605 = vmax.xlane.f32.xlu0 %v604_v2 }
 0x2a8   :  { %v499_v3 = vpop.f32.mrf.mxu3 }
 0x2a9   :  { %v544_v6 = vmul.f32 3.535534, %v499_v3 }
 0x2ab   :  { %v578_v7 = vsel %vm1393_vm9, -1e+09, %v544_v6 }
 0x2ac   :  { %v590_v8 = vsel %vm560_vm10, %v578_v7, -1e+30 }
 0x2ad   :  { %v607_v9 = vsel %vm594_vm8, %v590_v8, -inf }
 0x2ae   :  { %608 = vmax.xlane.f32.xlu2 %v607_v9 }
 0x2b0   :  { %v502_v10 = vpop.f32.mrf.mxu3 }
 0x2b1   :  { %v545_v11 = vmul.f32 3.535534, %v502_v10 }
 0x2b2   :  { %v534_v12 = vpop.f32.mrf.mxu0 }
 0x2b3   :  { %v546_v14 = vmul.f32 3.535534, %v534_v12  ;;  %v579_v15 = vsel %vm1386_vm5, -1e+09, %v545_v11 }
 0x2b4   :  { %v591_v16 = vsel %vm561_vm6, %v579_v15, -1e+30 }
 0x2b5   :  { %v610_v18 = vsel %vm594_vm8, %v591_v16, -inf  ;;  %v580_v19 = vsel %vm1393_vm9, -1e+09, %v546_v14 }
 0x2b6   :  { %611 = vmax.xlane.f32.xlu1 %v610_v18  ;;  %v592_v21 = vsel %vm560_vm10, %v580_v19, -1e+30 }
 0x2b7   :  { %v613_v22 = vsel %vm594_vm8, %v592_v21, -inf }
 0x2b8   :  { %614 = vmax.xlane.f32.xlu2 %v613_v22 }
 0x2ba   :  { %v537_v24 = vpop.f32.mrf.mxu0 }
 0x2bb   :  { %v547_v27 = vmul.f32 3.535534, %v537_v24 }
 0x2bd   :  { %v581_v30 = vsel %vm1386_vm5, -1e+09, %v547_v27 }
 0x2be   :  { %596 = vmax.xlane.f32.xlu1 %v595_v28  ;;  %v593_v31 = vsel %vm561_vm6, %v581_v30, -1e+30 }
 0x2bf   :  { %v616_v32 = vsel %vm594_vm8, %v593_v31, -inf }
 0x2c6   :  { %617 = vmax.xlane.f32.xlu1 %v616_v32 }
 0x310   :  { %v600_v33 = vpop.xlane.xlu2 %599 }
 0x311   :  { %v620_v34 = vsub.f32 %v587_v56, %v600_v33 }
 0x313   :  { %v629_v35 = vmul.f32 1.442695, %v620_v34 }
 0x315   :  { %1122 = vpow2.f32 %v629_v35 }
 0x318   :  { %v603_v36 = vpop.xlane.xlu2 %602 }
 0x319   :  { %v621_v37 = vsub.f32 %v588_v62, %v603_v36  ;;  %v606_v38 = vpop.xlane.xlu0 %605 }
 0x31a   :  { %v622_v39 = vsub.f32 %v589_v1, %v606_v38 }
 0x31b   :  { %v1426_v40 = vpop.eup %1122  ;;  %v631_v41 = vmul.f32 1.442695, %v621_v37 }
 0x31c   :  { %v633_v42 = vmul.f32 1.442695, %v622_v39  ;;  %v646_v43 = vsel %vm594_vm8, %v1426_v40, 0.0 }
 0x31d   :  { %1124 = vpow2.f32 %v631_v41  ;;  %647 = vadd.xlane.f32.xlu2 %v646_v43 }
 0x31e   :  { %1126 = vpow2.f32 %v633_v42 }
 0x321   :  { %v609_v48 = vpop.xlane.xlu2 %608 }
 0x322   :  { %v623_v51 = vsub.f32 %v590_v8, %v609_v48 }
 0x323   :  { %v1430_v44 = vpop.eup %1124 }
 0x324   :  { %v1432_v45 = vpop.eup %1126  ;;  %v649_v46 = vsel %vm594_vm8, %v1430_v44, 0.0  ;;  %v635_v53 = vmul.f32 1.442695, %v623_v51 }
 0x325   :  { %650 = vadd.xlane.f32.xlu0 %v649_v46  ;;  %v652_v47 = vsel %vm594_vm8, %v1432_v45, 0.0 }
 0x326   :  { %653 = vadd.xlane.f32.xlu1 %v652_v47 }
 0x329   :  { %v612_v49 = vpop.xlane.xlu1 %611 }
 0x32a   :  { %v624_v50 = vsub.f32 %v591_v16, %v612_v49 }
 0x32b   :  { %v615_v54 = vpop.xlane.xlu2 %614 }
 0x32c   :  { %v637_v52 = vmul.f32 1.442695, %v624_v50  ;;  %v625_v58 = vsub.f32 %v592_v21, %v615_v54 }
 0x32e   :  { %1128 = vpow2.f32 %v637_v52  ;;  %v639_v61 = vmul.f32 1.442695, %v625_v58 }
 0x32f   :  { %1130 = vpow2.f32 %v635_v53 }
 0x331   :  { %v597_v55 = vpop.xlane.xlu1 %596 }
 0x332   :  { %v619_v56 = vsub.f32 %v586_v25, %v597_v55 }
 0x334   :  { %v1438_v57 = vpop.eup %1128  ;;  %v627_v59 = vmul.f32 1.442695, %v619_v56 }
 0x335   :  { %v658_v60 = vsel %vm594_vm8, %v1438_v57, 0.0  ;;  %v1442_v63 = vpop.eup %1130 }
 0x336   :  { %1132 = vpow2.f32 %v627_v59  ;;  %659 = vadd.xlane.f32.xlu1 %v658_v60  ;;  %v655_v6 = vsel %vm594_vm8, %v1442_v63, 0.0 }
 0x337   :  { %1134 = vpow2.f32 %v639_v61 }
 0x339   :  { %v618_v62 = vpop.xlane.xlu1 %617 }
 0x33a   :  { %v626_v0 = vsub.f32 %v593_v31, %v618_v62 }
 0x33c   :  { %v1444_v1 = vpop.eup %1132  ;;  %v641_v2 = vmul.f32 1.442695, %v626_v0 }
 0x33d   :  { %v643_v3 = vsel %vm594_vm8, %v1444_v1, 0.0  ;;  %v1450_v7 = vpop.eup %1134 }
 0x33e   :  { %1136 = vpow2.f32 %v641_v2  ;;  %644 = vadd.xlane.f32.xlu2 %v643_v3  ;;  %656 = vadd.xlane.f32.xlu1 %v655_v6  ;;  %v661_v9 = vsel %vm594_vm8, %v1450_v7, 0.0 }
 0x344   :  { %v1452_v8 = vpop.eup %1136 }
 0x345   :  { %v664_v10 = vsel %vm594_vm8, %v1452_v8, 0.0 }
 0x346   :  { %662 = vadd.xlane.f32.xlu2 %v661_v9  ;;  %665 = vadd.xlane.f32.xlu0 %v664_v10 }
 0x390   :  { %v648_v11 = vpop.xlane.xlu2 %647 }
 0x391   :  { %1138 = vrcp.f32 %v648_v11  ;;  %v692_v18 = vand.u32 2147483648, %v648_v11  ;;  %v690_v21 = vand.u32 2147483647, %v648_v11  ;;  %vm686_vm12 = vweird.f32 %v648_v11 }
 0x393   :  { %v693_v24 = vor.u32 1.1754944e-38, %v692_v18  ;;  %vm691_vm14 = vcmp.eq.f32.partialorder %v690_v21, 8.507059e+37 }
 0x397   :  { %v1139_v12 = vpop.eup %1138 }
 0x398   :  { %v682_v13 = vmul.f32 %v1139_v12, %v648_v11  ;;  %v651_v14 = vpop.xlane.xlu0 %650  ;;  %vm687_vm11 = vweird.f32 %v1139_v12 }
 0x399   :  { %1140 = vrcp.f32 %v651_v14  ;;  %v654_v15 = vpop.xlane.xlu1 %653  ;;  %vm688_vm13 = vmor %vm686_vm12, %vm687_vm11  ;;  %v706_v34 = vand.u32 2147483648, %v651_v14  ;;  %v704_v37 = vand.u32 2147483647, %v651_v14  ;;  %vm700_vm2 = vweird.f32 %v651_v14 }
 0x39a   :  { %v683_v16 = vsub.f32 1.0, %v682_v13  ;;  %1142 = vrcp.f32 %v654_v15  ;;  %v720_v39 = vand.u32 2147483648, %v654_v15  ;;  %v718_v41 = vand.u32 2147483647, %v654_v15 }
 0x39b   :  { %v707_v43 = vor.u32 1.1754944e-38, %v706_v34  ;;  %vm714_vm3 = vweird.f32 %v654_v15  ;;  %vm705_vm6 = vcmp.eq.f32.partialorder %v704_v37, 8.507059e+37 }
 0x39c   :  { %v684_v19 = vmul.f32 %v1139_v12, %v683_v16  ;;  %v721_v47 = vor.u32 1.1754944e-38, %v720_v39  ;;  %vm719_vm7 = vcmp.eq.f32.partialorder %v718_v41, 8.507059e+37 }
 0x39e   :  { %v685_v22 = vadd.f32 %v1139_v12, %v684_v19 }
 0x39f   :  { %v1141_v23 = vpop.eup %1140 }
 0x3a0   :  { %v1143_v25 = vpop.eup %1142  ;;  %v696_v27 = vmul.f32 %v1141_v23, %v651_v14  ;;  %v689_v28 = vsel %vm688_vm13, %v1139_v12, %v685_v22  ;;  %vm701_vm15 = vweird.f32 %v1141_v23 }
 0x3a1   :  { %v710_v30 = vmul.f32 %v1143_v25, %v654_v15  ;;  %v694_v31 = vsel %vm691_vm14, %v693_v24, %v689_v28  ;;  %vm715_vm1 = vweird.f32 %v1143_v25  ;;  %vm702_vm4 = vmor %vm700_vm2, %vm701_vm15 }
 0x3a2   :  { %v697_v32 = vsub.f32 1.0, %v696_v27  ;;  %v780_v33 = vmul.f32 %v1426_v40, %v694_v31  ;;  %vm716_vm5 = vmor %vm714_vm3, %vm715_vm1 }
 0x3a3   :  { %v711_v35 = vsub.f32 1.0, %v710_v30 }
 0x3a4   :  { %v698_v36 = vmul.f32 %v1141_v23, %v697_v32  ;;  %788 = vst.msk [vmem:[#allocation8 + $0x8] sm:$0xff] %vm594_vm8, %v780_v33  ;;  %1091 = vmatpush.xpose.msk.msrb.mxu1 %vm594_vm8, %v780_v33 }
 0x3a5   :  { %v712_v38 = vmul.f32 %v1143_v25, %v711_v35 }
 0x3a6   :  { %v699_v42 = vadd.f32 %v1141_v23, %v698_v36 }
 0x3a7   :  { %v713_v46 = vadd.f32 %v1143_v25, %v712_v38 }
 0x3a8   :  { %v703_v40 = vsel %vm702_vm4, %v1141_v23, %v699_v42 }
 0x3a9   :  { %v660_v48 = vpop.xlane.xlu1 %659  ;;  %v717_v49 = vsel %vm716_vm5, %v1143_v25, %v713_v46  ;;  %v708_v50 = vsel %vm705_vm6, %v707_v43, %v703_v40 }
 0x3aa   :  { %1144 = vrcp.f32 %v660_v48  ;;  %v722_v51 = vsel %vm719_vm7, %v721_v47, %v717_v49  ;;  %v781_v52 = vmul.f32 %v1430_v44, %v708_v50  ;;  %v748_v44 = vand.u32 2147483648, %v660_v48 }
 0x3ab   :  { %v782_v53 = vmul.f32 %v1432_v45, %v722_v51  ;;  %v746_v45 = vand.u32 2147483647, %v660_v48  ;;  %vm742_vm10 = vweird.f32 %v660_v48 }
 0x3ac   :  { %789 = vst.msk [vmem:[#allocation8 + $0x10] sm:$0xff] %vm594_vm8, %v781_v52  ;;  %v749_v3 = vor.u32 1.1754944e-38, %v748_v44 }
 0x3ad   :  { %790 = vst.msk [vmem:[#allocation8 + $0x18] sm:$0xff] %vm594_vm8, %v782_v53  ;;  %1094 = vmatpush.xpose.msk.msrb.mxu2 %vm594_vm8, %v782_v53  ;;  %vm747_vm12 = vcmp.eq.f32.partialorder %v746_v45, 8.507059e+37 }
 0x3b0   :  { %v1145_v54 = vpop.eup %1144 }
 0x3b1   :  { %v738_v55 = vmul.f32 %v1145_v54, %v660_v48  ;;  %v645_v56 = vpop.xlane.xlu2 %644  ;;  %v657_v58 = vpop.xlane.xlu1 %656  ;;  %1095 = vmatpush.xpose.msk.msrb.mxu2 %vm594_vm8, %v781_v52  ;;  %vm743_vm9 = vweird.f32 %v1145_v54 }
 0x3b2   :  { %1146 = vrcp.f32 %v645_v56  ;;  %vm744_vm11 = vmor %vm742_vm10, %vm743_vm9  ;;  %v678_v14 = vand.u32 2147483648, %v645_v56  ;;  %v676_v16 = vand.u32 2147483647, %v645_v56  ;;  %v734_v19 = vand.u32 2147483648, %v657_v58 }
 0x3b3   :  { %v739_v59 = vsub.f32 1.0, %v738_v55  ;;  %1148 = vrcp.f32 %v657_v58  ;;  %vm672_vm15 = vweird.f32 %v645_v56  ;;  %v732_v22 = vand.u32 2147483647, %v657_v58 }
 0x3b4   :  { %1096 = vmatmul.msk.f32.vlgmr.msrb.gmra.mxu2 %vm594_vm8, %v1352_v20  ;;  %v679_v25 = vor.u32 1.1754944e-38, %v678_v14  ;;  %vm728_vm1 = vweird.f32 %v657_v58  ;;  %vm677_vm4 = vcmp.eq.f32.partialorder %v676_v16, 8.507059e+37  ;;  %v735_v32 = vor.u32 1.1754944e-38, %v734_v19 }
 0x3b5   :  { %v740_v60 = vmul.f32 %v1145_v54, %v739_v59  ;;  %vm733_vm5 = vcmp.eq.f32.partialorder %v732_v22, 8.507059e+37 }
 0x3b7   :  { %v741_v61 = vadd.f32 %v1145_v54, %v740_v60 }
 0x3b8   :  { %v1147_v62 = vpop.eup %1146 }
 0x3b9   :  { %v1149_v0 = vpop.eup %1148  ;;  %v745_v2 = vsel %vm744_vm11, %v1145_v54, %v741_v61  ;;  %v668_v6 = vmul.f32 %v1147_v62, %v645_v56  ;;  %v663_v9 = vpop.xlane.xlu2 %662  ;;  %vm673_vm13 = vweird.f32 %v1147_v62  ;;  %v138_v56 = vld [vmem:[#allocation5 + $0x8] sm:$0xff] }
 0x3ba   :  { %v1469_v10 = vpop.xlane.xlu0 %665  ;;  %v724_v11 = vmul.f32 %v1149_v0, %v657_v58  ;;  %1150 = vrcp.f32 %v663_v9  ;;  %v750_v12 = vsel %vm747_vm12, %v749_v3, %v745_v2  ;;  %vm729_vm14 = vweird.f32 %v1149_v0  ;;  %vm674_vm2 = vmor %vm672_vm15, %vm673_vm13 }
 0x3bb   :  { %v669_v13 = vsub.f32 1.0, %v668_v6  ;;  %1152 = vrcp.f32 %v1469_v10  ;;  %v784_v21 = vmul.f32 %v1438_v57, %v750_v12  ;;  %vm730_vm3 = vmor %vm728_vm1, %vm729_vm14  ;;  %v760_v37 = vand.u32 2147483647, %v663_v9 }
 0x3bc   :  { %v725_v15 = vsub.f32 1.0, %v724_v11  ;;  %v762_v38 = vand.u32 2147483648, %v663_v9  ;;  %vm756_vm7 = vweird.f32 %v663_v9  ;;  %v776_v46 = vand.u32 2147483648, %v1469_v10 }
 0x3bd   :  { %v670_v20 = vmul.f32 %v1147_v62, %v669_v13  ;;  %792 = vst.msk [vmem:[#allocation8 + $0x28] sm:$0xff] %vm594_vm8, %v784_v21  ;;  %1097 = vmatpush.xpose.msk.msra.mxu3 %vm594_vm8, %v784_v21  ;;  %vm761_vm11 = vcmp.eq.f32.partialorder %v760_v37, 8.507059e+37  ;;  %vm770_vm12 = vweird.f32 %v1469_v10  ;;  %v1269_v6 = vmov 32.0  }
 0x3be   :  { %v726_v18 = vmul.f32 %v1149_v0, %v725_v15  ;;  %v763_v48 = vor.u32 1.1754944e-38, %v762_v38  ;;  %v777_v50 = vor.u32 1.1754944e-38, %v776_v46  ;;  %1154 = vrcp.f32 %v1269_v6  ;;  %v1121_v46 = vld [vmem:[%s1533_s7] ss:$0 sm:$0xff] }
 0x3bf   :  { %v671_v23 = vadd.f32 %v1147_v62, %v670_v20 }
 0x3c0   :  { %v1151_v24 = vpop.eup %1150  ;;  %v727_v27 = vadd.f32 %v1149_v0, %v726_v18 }
 0x3c1   :  { %v752_v28 = vmul.f32 %v1151_v24, %v663_v9  ;;  %v675_v30 = vsel %vm674_vm2, %v1147_v62, %v671_v23  ;;  %v1153_v31 = vpop.eup %1152  ;;  %vm757_vm6 = vweird.f32 %v1151_v24 }
 0x3c2   :  { %v680_v57 = vsel %vm677_vm4, %v679_v25, %v675_v30  ;;  %v731_v33 = vsel %vm730_vm3, %v1149_v0, %v727_v27  ;;  %v766_v35 = vmul.f32 %v1153_v31, %v1469_v10  ;;  %vm771_vm9 = vweird.f32 %v1153_v31  ;;  %vm758_vm10 = vmor %vm756_vm7, %vm757_vm6 }
 0x3c3   :  { %v753_v34 = vsub.f32 1.0, %v752_v28  ;;  %v779_v36 = vmul.f32 %v1444_v1, %v680_v57  ;;  %v736_v39 = vsel %vm733_vm5, %v735_v32, %v731_v33  ;;  %v774_v1 = vand.u32 2147483647, %v1469_v10  ;;  %vm772_vm13 = vmor %vm770_vm12, %vm771_vm9 }
 0x3c4   :  { %v767_v42 = vsub.f32 1.0, %v766_v35  ;;  %v783_v43 = vmul.f32 %v1442_v63, %v736_v39  ;;  %v1155_v9 = vpop.eup %1154  ;;  %v1120_v39 = vld [vmem:[%s1532_s6] ss:$0 sm:$0xff]  ;;  %s1271_s6 = smov [#allocation7]  }
 0x3c5   :  { %v754_v41 = vmul.f32 %v1151_v24, %v753_v34  ;;  %787 = vst.msk [vmem:[#allocation8] sm:$0xff] %vm594_vm8, %v779_v36  ;;  %1092 = vmatpush.xpose.msk.msrb.mxu1 %vm594_vm8, %v779_v36  ;;  %vm775_vm14 = vcmp.eq.f32.partialorder %v774_v1, 8.507059e+37  ;;  %v979_v10 = vmul.f32 32.0, %v1155_v9  ;;  %s1039_s14 = sshll.u32 %s1271_s6, 4  ;;  %s1040_s14 = int_to_ptr.vmem [resolvable:$true] %s1039_s14 }
 0x3c6   :  { %v768_v47 = vmul.f32 %v1153_v31, %v767_v42  ;;  %791 = vst.msk [vmem:[#allocation8 + $0x20] sm:$0xff] %vm594_vm8, %v783_v43  ;;  %1098 = vmatpush.xpose.msk.msra.mxu3 %vm594_vm8, %v783_v43 }
 0x3c7   :  { %v755_v40 = vadd.f32 %v1151_v24, %v754_v41  ;;  %v980_v11 = vsub.f32 1.0, %v979_v10 }
 0x3c8   :  { %1093 = vmatmul.msk.f32.vlgmr.msrb.gmra.mxu1 %vm594_vm8, %v1348_v17  ;;  %v769_v49 = vadd.f32 %v1153_v31, %v768_v47  ;;  %v140_v17 = vld [vmem:[#allocation5 + $0x18] sm:$0xff] }
 0x3c9   :  { %v759_v63 = vsel %vm758_vm10, %v1151_v24, %v755_v40  ;;  %1099 = vmatmul.msk.f32.vlgmr.msra.gmra.mxu3 %vm594_vm8, %v1357_v26  ;;  %v139_v26 = vld [vmem:[#allocation5 + $0x10] sm:$0xff]  ;;  %961 = vmatpush.msra.mxu2 %v140_v17  ;;  %v981_v12 = vmul.f32 %v1155_v9, %v980_v11 }
 0x3ca   :  { %v764_v51 = vsel %vm761_vm11, %v763_v48, %v759_v63  ;;  %v773_v52 = vsel %vm772_vm13, %v1153_v31, %v769_v49 }
 0x3cb   :  { %v785_v53 = vmul.f32 %v1450_v7, %v764_v51  ;;  %v778_v54 = vsel %vm775_vm14, %v777_v50, %v773_v52  ;;  %962 = vmatpush.msra.mxu2 %v139_v26  ;;  %v137_v7 = vld [vmem:[#allocation5] sm:$0xff]  ;;  %v982_v13 = vadd.f32 %v1155_v9, %v981_v12 }
 0x3cc   :  { %v786_v55 = vmul.f32 %v1452_v8, %v778_v54 }
 0x3cd   :  { %793 = vst.msk [vmem:[#allocation8 + $0x30] sm:$0xff] %vm594_vm8, %v785_v53  ;;  %963 = vmatpush.msra.mxu2 %v138_v56 }
 0x3ce   :  { %794 = vst.msk [vmem:[#allocation8 + $0x38] sm:$0xff] %vm594_vm8, %v786_v55  ;;  %1100 = vmatpush.xpose.msk.msra.mxu1 %vm594_vm8, %v786_v55 }
 0x3cf   :  { %964 = vmatpush.msra.mxu2 %v137_v7  ;;  %1060 = dma.vmem_to_hbm [thread:$0]  %s1053_s3, 1024, %s1055_s10, [#allocation9], %s1265_s17, %s1265_s17, %s1266_s18  }
 0x3d2   :  { %1101 = vmatpush.xpose.msk.msra.mxu1 %vm594_vm8, %v785_v53 }
 0x3d5   :  { %1102 = vmatmul.msk.f32.vlgmr.msra.gmra.mxu1 %vm594_vm8, %v1367_v29  ;;  %vm983_vm8 = vweird.f32 %v1155_v9 }
 0x3d6   :  { %v984_v14 = vsel %vm983_vm8, %v1155_v9, %v982_v13 }
 0x437   :  { %v850_v8 = vpop.f32.mrf.mxu2 }
 0x445   :  { %v821_v58 = vpop.f32.mrf.mxu1 }
 0x446   :  { %911 = vxpose.xlu1.b32.start [1/4] (short) (narrow) %v821_v58, 16 }
 0x44c   :  { %v879_v59 = vpop.f32.mrf.mxu3 }
 0x44e   :  { %912 = vxpose.xlu1.b32.cont [2/4] (short) (narrow) %v850_v8, 16 }
 0x452   :  { %v908_v60 = vpop.f32.mrf.mxu1 }
 0x456   :  { %913 = vxpose.xlu1.b32.cont [3/4] (short) (narrow) %v879_v59, 16 }
 0x45e   :  { %914 = vxpose.xlu1.b32.end [4/4] (short) (narrow) %v908_v60, 16 }
 0x4ea   :  { %v927_v44 = vpop.trf.xlu1 }
 0x4eb   :  { %1103 = vmatmul.msk.f32.vlgmr.msra.gmra.mxu2 %vm71_vm0, %v927_v44 }
 0x4f2   :  { %v928_v29 = vpop.trf.xlu1 }
 0x4f3   :  { %1104 = vmatmul.msk.f32.gmra.mxu2 %vm71_vm0, %v928_v29 }
 0x56e   :  { %v966_v45 = vpop.f32.mrf.mxu2 }
 0x56f   :  { %v967_v61 = vadd.f32 %v966_v45, %v1337_v4 }
 0x571   :  { %v972_v62 = vsel %vm71_vm0, %v967_v61, 0.0 }
 0x572   :  { %973 = vadd.xlane.f32.xlu0 %v972_v62 }
 0x576   :  { %v969_v0 = vpop.f32.mrf.mxu2 }
 0x577   :  { %v970_v2 = vadd.f32 %v969_v0, %v1344_v5 }
 0x579   :  { %v975_v3 = vsel %vm71_vm0, %v970_v2, 0.0 }
 0x57a   :  { %976 = vadd.xlane.f32.xlu2 %v975_v3 }
 0x5e5   :  { %v974_v15 = vpop.xlane.xlu0 %973 }
 0x5e6   :  { %v985_v4 = vmul.f32 %v984_v14, %v974_v15 }
 0x5e8   :  { %v987_v20 = vsub.f32 %v967_v61, %v985_v4 }
 0x5ea   :  { %v989_v16 = vmul.f32 %v987_v20, %v987_v20 }
 0x5ec   :  { %v991_v18 = vsel %vm71_vm0, %v989_v16, 0.0 }
 0x5ed   :  { %992 = vadd.xlane.f32.xlu0 %v991_v18  ;;  %v977_v5 = vpop.xlane.xlu2 %976 }
 0x5ee   :  { %v986_v19 = vmul.f32 %v984_v14, %v977_v5 }
 0x5f0   :  { %v988_v21 = vsub.f32 %v970_v2, %v986_v19 }
 0x5f2   :  { %v990_v22 = vmul.f32 %v988_v21, %v988_v21 }
 0x5f4   :  { %v994_v23 = vsel %vm71_vm0, %v990_v22, 0.0 }
 0x5f5   :  { %995 = vadd.xlane.f32.xlu2 %v994_v23 }
 0x660   :  { %v993_v24 = vpop.xlane.xlu0 %992 }
 0x661   :  { %v997_v25 = vmul.f32 %v993_v24, %v984_v14 }
 0x663   :  { %v999_v27 = vadd.f32 1e-05, %v997_v25 }
 0x665   :  { %1156 = vrsqrt.f32 %v999_v27  ;;  %vm1007_vm1 = vweird.f32 %v999_v27 }
 0x668   :  { %v996_v28 = vpop.xlane.xlu2 %995 }
 0x669   :  { %v998_v30 = vmul.f32 %v996_v28, %v984_v14 }
 0x66b   :  { %v1157_v31 = vpop.eup %1156  ;;  %v1000_v32 = vadd.f32 1e-05, %v998_v30 }
 0x66c   :  { %v1002_v57 = vmul.f32 %v1157_v31, %v999_v27  ;;  %vm1008_vm15 = vweird.f32 %v1157_v31 }
 0x66d   :  { %1158 = vrsqrt.f32 %v1000_v32  ;;  %vm1009_vm2 = vmor %vm1007_vm1, %vm1008_vm15  ;;  %vm1017_vm4 = vweird.f32 %v1000_v32 }
 0x66e   :  { %v1003_v33 = vmul.f32 %v1157_v31, %v1002_v57 }
 0x670   :  { %v1004_v34 = vmul.f32 0.5, %v1003_v33 }
 0x672   :  { %v1005_v35 = vsub.f32 1.5, %v1004_v34 }
 0x673   :  { %v1159_v36 = vpop.eup %1158 }
 0x674   :  { %v1006_v37 = vmul.f32 %v1157_v31, %v1005_v35  ;;  %v1012_v38 = vmul.f32 %v1159_v36, %v1000_v32  ;;  %vm1018_vm3 = vweird.f32 %v1159_v36 }
 0x675   :  { %vm1019_vm5 = vmor %vm1017_vm4, %vm1018_vm3 }
 0x676   :  { %v1010_v41 = vsel %vm1009_vm2, %v1157_v31, %v1006_v37  ;;  %v1013_v42 = vmul.f32 %v1159_v36, %v1012_v38 }
 0x677   :  { %v1021_v43 = vmul.f32 %v1010_v41, %v987_v20 }
 0x678   :  { %v1014_v40 = vmul.f32 0.5, %v1013_v42 }
 0x679   :  { %v1026_v47 = vmul.f32 %v1120_v39, %v1021_v43 }
 0x67a   :  { %v1015_v1 = vsub.f32 1.5, %v1014_v40 }
 0x67b   :  { %v1031_v48 = vadd.f32 %v1121_v46, %v1026_v47 }
 0x67c   :  { %v1016_v49 = vmul.f32 %v1159_v36, %v1015_v1 }
 0x67d   :  { %1033 = vst.msk [vmem:[#allocation7] sm:$0xff] %vm71_vm0, %v1031_v48 }
 0x67e   :  { %v1020_v63 = vsel %vm1019_vm5, %v1159_v36, %v1016_v49 }
 0x67f   :  { %v1022_v50 = vmul.f32 %v1020_v63, %v988_v21 }
 0x681   :  { %v1027_v51 = vmul.f32 %v1120_v39, %v1022_v50 }
 0x683   :  { %v1032_v52 = vadd.f32 %v1121_v46, %v1027_v51 }
 0x685   :  { %1034 = vst.msk [vmem:[#allocation7 + $0x8] sm:$0xff] %vm71_vm0, %v1032_v52 }
 0x686   :  { %1047 = dma.vmem_to_hbm [thread:$0]  %s1040_s14, 256, %s1042_s19, [#allocation4], %s1265_s17, %s1265_s17, %s1266_s18  }
 0x687   :  { %1260 = dma.done.wait [#allocation4], 256  }
 0x688   :  { %1261 = vsyncadd [#allocation4], 4294967040 }
 0x689   :  { %1262 = dma.done.wait [#allocation9], 1024  }
 0x68a   :  { %1263 = vsyncadd [#allocation9], 4294966272 }
 0x68b   :  { %1069 = vsyncpa [#allocation3], 1 }
 0x68c   :  { %1070 = vsyncpa [#allocation6], 1 }
 0x68d   :  { %1071 = vsyncpa [#allocation4], 1 }
 0x68e   :  { %1072 = vsyncpa [#allocation9], 1 }

</bundles_post_ra>
